<compile_context>
chip_gen: v6e
topology: v6e:2x2x1
jax: 0.10.0
libtpu: 0.0.40
codegen_flags: <defaults>
</compile_context>

<pallas_src>
import functools

import jax
import jax.numpy as jnp
from jax.experimental import pallas as pl
from jax.experimental.pallas import tpu as pltpu

_LANES = 128
_SUBLANES = 8
_CHUNK_ROWS = 128   # rows folded per inner-loop iteration (16 f32 vregs per operand)


def _cdiv(a, b):
    return -(-a // b)


def _round_up(a, b):
    return _cdiv(a, b) * b


def _tpu_topology():
    """Returns (num_tensorcores, per-input target block bytes); conservative fallback."""
    cores = 1
    try:
        info = pltpu.get_tpu_info()
        for name in ("num_cores", "num_tensorcores", "num_tensor_cores",
                     "core_count", "cores_per_chip"):
            v = getattr(info, name, None)
            if isinstance(v, int) and 1 <= v <= 8:
                cores = min(v, 2)
                break
    except Exception:
        cores = 1
    # 2 MiB blocks on single-TC chips (v5e/v6e), 4 MiB on dual-TC (v7x, 3.2 TB/s HBM).
    target_bytes = (4 if cores >= 2 else 2) * 1024 * 1024
    return cores, target_bytes


def _mse_partial_kernel(x_ref, t_ref, acc_ref, *, valid_rows, needs_mask, chunk_rows):
    """Accumulate per-(sublane,lane) partial sums of (x - t)^2 into an (8,128) block.

    Grid = (split, step). The output block index depends only on `split`, so it stays
    resident in VMEM across the "arbitrary" step axis and acts as an accumulator.
    The block is consumed in 128-row chunks carried in a vreg accumulator, so no
    block-sized temporary is spilled to VMEM.
    """
    split = pl.program_id(0)
    step = pl.program_id(1)

    @pl.when(step == 0)
    def _():
        acc_ref[...] = jnp.zeros_like(acc_ref)

    tile_rows = x_ref.shape[0]
    # Logical first row of this grid step (matches the *unclamped* index_map).
    block_row0 = (split * pl.num_programs(1) + step) * tile_rows

    def sq_chunk(r0, nrows):
        xv = x_ref[pl.ds(r0, nrows), :].astype(jnp.float32)
        tv = t_ref[pl.ds(r0, nrows), :].astype(jnp.float32)
        d = xv - tv
        if needs_mask:
            rid = (block_row0 + r0
                   + jax.lax.broadcasted_iota(jnp.int32, (nrows, _LANES), 0))
            d = jnp.where(rid < valid_rows, d, 0.0)
        return d * d

    def fold(sq, nrows):
        # (nrows,128) -> (nrows/8, 8, 128) -> VPU adds into an (8,128) partial.
        return jnp.sum(sq.reshape(nrows // _SUBLANES, _SUBLANES, _LANES), axis=0)

    acc = jnp.zeros((_SUBLANES, _LANES), jnp.float32)

    n_chunks = tile_rows // chunk_rows          # static
    if n_chunks > 0:
        def body(c, a):
            r0 = c * chunk_rows
            if not isinstance(r0, int):
                r0 = pl.multiple_of(r0, chunk_rows)
            return a + fold(sq_chunk(r0, chunk_rows), chunk_rows)

        if n_chunks == 1:
            acc = body(0, acc)
        else:
            acc = jax.lax.fori_loop(0, n_chunks, body, acc, unroll=2)

    done = n_chunks * chunk_rows                # static
    rem8 = ((tile_rows - done) // _SUBLANES) * _SUBLANES
    if rem8 > 0:
        acc = acc + fold(sq_chunk(done, rem8), rem8)

    tail = tile_rows - done - rem8              # static, < 8 rows (small full-dim blocks)
    if tail > 0:
        row_sum = jnp.sum(sq_chunk(done + rem8, tail), axis=0, keepdims=True)  # (1,128)
        first_row = jax.lax.broadcasted_iota(jnp.int32, (_SUBLANES, _LANES), 0) == 0
        acc = acc + jnp.where(first_row, row_sum, 0.0)

    acc_ref[...] += acc


def _mse_sum_sq(x, target, *, max_tile_rows=None):
    """Sum of squared differences in f32; the lane-aligned bulk runs in the kernel."""
    assert x.shape == target.shape, "input/target shape mismatch"
    total = int(x.size)
    xf = x.reshape(-1)
    tf = target.reshape(-1)

    bulk = (total // _LANES) * _LANES
    rem = total - bulk

    sum_sq = jnp.zeros((), jnp.float32)
    if rem:
        # Ragged tail (< 128 elements): plain XLA. This replaces the old full-array
        # jnp.pad copy for shapes whose size is not a multiple of 128.
        dt = xf[bulk:].astype(jnp.float32) - tf[bulk:].astype(jnp.float32)
        sum_sq = sum_sq + jnp.sum(dt * dt)

    if bulk == 0:
        return sum_sq

    rows = bulk // _LANES
    x2 = (xf if not rem else xf[:bulk]).reshape(rows, _LANES)
    t2 = (tf if not rem else tf[:bulk]).reshape(rows, _LANES)

    x_item = jnp.dtype(x.dtype).itemsize
    t_item = jnp.dtype(target.dtype).itemsize
    min_item = min(x_item, t_item)
    sub_mult = max(_SUBLANES, 32 // min_item)        # 8 f32 / 16 bf16 / 32 int8

    splits, target_bytes = _tpu_topology()
    tile_cap = target_bytes // (_LANES * min_item)   # constant block bytes across dtypes
    tile_cap = max(sub_mult, (tile_cap // sub_mult) * sub_mult)
    if max_tile_rows is not None:
        tile_cap = max(sub_mult, min(tile_cap, _round_up(max_tile_rows, sub_mult)))

    if rows < 2 * tile_cap:
        splits = 1                                   # too little work to shard across TCs
    # Full-dim block (always a legal block shape) when everything fits in one block,
    # otherwise a sub_mult-aligned cap with in-kernel masking of the last block.
    tile_rows = rows if rows <= tile_cap else tile_cap

    total_blocks = _cdiv(rows, tile_rows)
    blocks_per_split = _cdiv(total_blocks, splits)
    needs_mask = splits * blocks_per_split * tile_rows != rows
    max_block = total_blocks - 1

    def in_map(s, i):
        # Clamp so any phantom step (possible only when splits=2 and the block count is
        # odd) re-reads the last real block; its contribution is masked to zero.
        return (jnp.minimum(s * blocks_per_split + i, max_block), 0)

    kernel = functools.partial(
        _mse_partial_kernel,
        valid_rows=rows,
        needs_mask=needs_mask,
        chunk_rows=_CHUNK_ROWS,
    )

    partials = pl.pallas_call(
        kernel,
        out_shape=jax.ShapeDtypeStruct((splits * _SUBLANES, _LANES), jnp.float32),
        grid_spec=pltpu.PrefetchScalarGridSpec(
            num_scalar_prefetch=0,
            grid=(splits, blocks_per_split),
            in_specs=[
                pl.BlockSpec((tile_rows, _LANES), in_map),
                pl.BlockSpec((tile_rows, _LANES), in_map),
            ],
            out_specs=pl.BlockSpec((_SUBLANES, _LANES), lambda s, i: (s, 0)),
        ),
        compiler_params=pltpu.CompilerParams(
            dimension_semantics=("parallel", "arbitrary"),
            vmem_limit_bytes=32 * 1024 * 1024,
        ),
        cost_estimate=pl.CostEstimate(
            flops=3 * bulk,
            transcendentals=0,
            bytes_accessed=bulk * (x_item + t_item) + splits * _SUBLANES * _LANES * 4,
        ),
    )(x2, t2)

    # Tiny final reduce (at most 16x128 floats) in the wrapper.
    return sum_sq + jnp.sum(partials)


def _mse_forward(x, target, *, max_tile_rows=None):
    total = int(x.size)
    return _mse_sum_sq(x, target, max_tile_rows=max_tile_rows) / jnp.float32(total)


@jax.custom_vjp
def mse_loss_pallas(x, target):
    """mean((x - target)**2) via a Pallas TPU streaming reduction (differentiable)."""
    return _mse_forward(x, target)


def _mse_fwd(x, target):
    return _mse_forward(x, target), (x, target)


def _mse_bwd(res, g):
    x, target = res
    scale = (g * (2.0 / x.size)).astype(jnp.float32)
    diff = x.astype(jnp.float32) - target.astype(jnp.float32)
    gx = scale * diff
    # d/d(target) = -gx. ContentLossPallas stop_gradients its target, so under jax.jit
    # this second cotangent is dead code and adds no HBM traffic.
    return gx.astype(x.dtype), (-gx).astype(target.dtype)


mse_loss_pallas.defvjp(_mse_fwd, _mse_bwd)


class ContentLossPallas:
    """JAX/Pallas port of the PyTorch ContentLoss module.

    __init__ captures a detached (stop_gradient) target; __call__ computes
    self.loss = MSE(input, target) and returns the input unchanged.
    NOTE: self.loss is a Python-attribute side effect (mirroring the nn.Module); inside
    jit/scan prefer calling mse_loss_pallas directly and threading the loss explicitly.
    """

    def __init__(self, target):
        self.target = jax.lax.stop_gradient(target)
        self.loss = None

    def __call__(self, x):
        self.loss = mse_loss_pallas(x, self.target)
        return x


if __name__ == "__main__":
    key = jax.random.PRNGKey(0)
    k1, k2, k3, k4, k5, k6, k7, k8 = jax.random.split(key, 8)

    # 1) Lane-aligned NCHW feature map (the ContentLoss use case).
    x = jax.random.normal(k1, (2, 4, 16, 16), dtype=jnp.float32)
    target = jax.random.normal(k2, (2, 4, 16, 16), dtype=jnp.float32)
    module = ContentLossPallas(target)
    out = jax.block_until_ready(module(x))
    loss = jax.block_until_ready(module.loss)
    ref = jnp.mean((x - target) ** 2)
    assert jnp.allclose(loss, ref, rtol=1e-5, atol=1e-6), (loss, ref)
    assert jnp.array_equal(out, x)

    # 2) bf16 inputs (dtype-aware tiling path).
    xb, tb = x.astype(jnp.bfloat16), target.astype(jnp.bfloat16)
    loss_b = jax.block_until_ready(mse_loss_pallas(xb, tb))
    ref_b = jnp.mean((xb.astype(jnp.float32) - tb.astype(jnp.float32)) ** 2)
    assert jnp.allclose(loss_b, ref_b, rtol=1e-5, atol=1e-6), (loss_b, ref_b)

    # 3) Tiny unaligned total (210 elements): handled entirely by the no-pad tail path.
    xs = jax.random.normal(k3, (2, 3, 5, 7), dtype=jnp.float32)
    ts = jax.random.normal(k4, (2, 3, 5, 7), dtype=jnp.float32)
    loss_s = jax.block_until_ready(mse_loss_pallas(xs, ts))
    ref_s = jnp.mean((xs - ts) ** 2)
    assert jnp.allclose(loss_s, ref_s, rtol=1e-5, atol=1e-6), (loss_s, ref_s)

    # 4) Mid-size unaligned total (1581 elements): kernel bulk + wrapper tail, and the
    #    sub-8-row in-kernel fold.
    xm = jax.random.normal(k5, (1, 3, 17, 31), dtype=jnp.float32)
    tm_ = jax.random.normal(k6, (1, 3, 17, 31), dtype=jnp.float32)
    loss_m = jax.block_until_ready(mse_loss_pallas(xm, tm_))
    ref_m = jnp.mean((xm - tm_) ** 2)
    assert jnp.allclose(loss_m, ref_m, rtol=1e-5, atol=1e-6), (loss_m, ref_m)

    # 5) Multi-block grid with a ragged last block (small tile cap keeps shapes small):
    #    exercises the fori_loop chunking, in-kernel row masking and the resident
    #    accumulator across the "arbitrary" axis.
    xl = jax.random.normal(k7, (1, 4, 96, 104), dtype=jnp.float32)   # 312 rows of 128
    tl = jax.random.normal(k8, (1, 4, 96, 104), dtype=jnp.float32)
    loss_l = jax.block_until_ready(_mse_forward(xl, tl, max_tile_rows=256))
    ref_l = jnp.mean((xl - tl) ** 2)
    assert jnp.allclose(loss_l, ref_l, rtol=1e-5, atol=1e-6), (loss_l, ref_l)

    # 6) Gradient w.r.t. the input (the style-transfer hot path), under jit so the
    #    unused target-cotangent is DCE'd.
    grad_fn = jax.jit(jax.grad(lambda xi: mse_loss_pallas(xi, target)))
    gx = jax.block_until_ready(grad_fn(x))
    gref = 2.0 * (x - target) / x.size
    assert jnp.allclose(gx, gref, rtol=1e-5, atol=1e-6)

    print("KERNEL_OK")
</pallas_src>

<mosaic_0001>
module attributes {stable_mosaic.version = 11 : i64} {
  func.func @_mse_partial_kernel(%arg0: i32, %arg1: i32, %arg2: memref<16x128xf32, #tpu.memory_space<vmem>>, %arg3: memref<16x128xf32, #tpu.memory_space<vmem>>, %arg4: memref<8x128xf32, #tpu.memory_space<vmem>>) attributes {dimension_semantics = [#tpu.dimension_semantics<parallel>, #tpu.dimension_semantics<arbitrary>], iteration_bounds = array<i64: 1, 1>, scalar_prefetch = 0 : i64, scratch_operands = 0 : i64, tpu.core_type = #tpu.core_type<tc>, window_params = [{transform_indices = @transform_0, window_bounds = array<i64: 16, 128>}, {transform_indices = @transform_1, window_bounds = array<i64: 16, 128>}, {transform_indices = @transform_2, window_bounds = array<i64: 8, 128>}]} {
    %c0_i32 = arith.constant 0 : i32
    %0 = arith.cmpi eq, %arg1, %c0_i32 : i32
    %1 = arith.extui %0 : i1 to i32
    %c0_i32_0 = arith.constant 0 : i32
    %2 = arith.cmpi ne, %1, %c0_i32_0 : i32
    scf.if %2 {
      %cst_9 = arith.constant 0.000000e+00 : f32
      %14 = vector.broadcast %cst_9 : f32 to vector<8x128xf32>
      %c0_10 = arith.constant 0 : index
      %c0_11 = arith.constant 0 : index
      %15 = vector.load %arg4[%c0_10, %c0_11] : memref<8x128xf32, #tpu.memory_space<vmem>>, vector<8x128xf32>
      tpu.vector_store %arg4[%c0_10, %c0_11], %14 {strides = array<i32>} : memref<8x128xf32, #tpu.memory_space<vmem>>, vector<8x128xf32>,
    } else {
    }
    %cst = arith.constant 0.000000e+00 : f32
    %3 = vector.broadcast %cst : f32 to vector<8x128xf32>
    %c0 = arith.constant 0 : index
    %c0_1 = arith.constant 0 : index
    %4 = vector.load %arg2[%c0, %c0_1] : memref<16x128xf32, #tpu.memory_space<vmem>>, vector<16x128xf32>
    %c0_2 = arith.constant 0 : index
    %c0_3 = arith.constant 0 : index
    %5 = vector.load %arg3[%c0_2, %c0_3] : memref<16x128xf32, #tpu.memory_space<vmem>>, vector<16x128xf32>
    %6 = arith.subf %4, %5 : vector<16x128xf32>
    %7 = arith.mulf %6, %6 : vector<16x128xf32>
    %8 = vector.shape_cast %7 : vector<16x128xf32> to vector<2x8x128xf32>
    %cst_4 = arith.constant dense<0.000000e+00> : vector<8x128xf32>
    %9 = vector.multi_reduction <add>, %8, %cst_4 [0] : vector<2x8x128xf32> to vector<8x128xf32>
    %10 = arith.addf %3, %9 : vector<8x128xf32>
    %c0_5 = arith.constant 0 : index
    %c0_6 = arith.constant 0 : index
    %11 = vector.load %arg4[%c0_5, %c0_6] : memref<8x128xf32, #tpu.memory_space<vmem>>, vector<8x128xf32>
    %12 = arith.addf %11, %10 : vector<8x128xf32>
    %c0_7 = arith.constant 0 : index
    %c0_8 = arith.constant 0 : index
    %13 = vector.load %arg4[%c0_7, %c0_8] : memref<8x128xf32, #tpu.memory_space<vmem>>, vector<8x128xf32>
    tpu.vector_store %arg4[%c0_7, %c0_8], %12 {strides = array<i32>} : memref<8x128xf32, #tpu.memory_space<vmem>>, vector<8x128xf32>,
    return
  }
  func.func @transform_0(%arg0: i32, %arg1: i32) -> (i32, i32) {
    %c1_i32 = arith.constant 1 : i32
    %0 = arith.muli %arg0, %c1_i32 : i32
    %1 = arith.addi %0, %arg1 : i32
    %c0_i32 = arith.constant 0 : i32
    %2 = arith.minsi %1, %c0_i32 : i32
    %c0_i32_0 = arith.constant 0 : i32
    %c0_i32_1 = arith.constant 0 : i32
    return %2, %c0_i32_0 : i32, i32
  }
  func.func @transform_1(%arg0: i32, %arg1: i32) -> (i32, i32) {
    %c1_i32 = arith.constant 1 : i32
    %0 = arith.muli %arg0, %c1_i32 : i32
    %1 = arith.addi %0, %arg1 : i32
    %c0_i32 = arith.constant 0 : i32
    %2 = arith.minsi %1, %c0_i32 : i32
    %c0_i32_0 = arith.constant 0 : i32
    %c0_i32_1 = arith.constant 0 : i32
    return %2, %c0_i32_0 : i32, i32
  }
  func.func @transform_2(%arg0: i32, %arg1: i32) -> (i32, i32) {
    %c0_i32 = arith.constant 0 : i32
    %c0_i32_0 = arith.constant 0 : i32
    return %arg0, %c0_i32 : i32, i32
  }
}

</mosaic_0001>

<bundles_post_ra>
// kernel: tpu_custom_call.1
= control target key start
LH: loop header
LB: loop body
LE: loop exit
PB: predicated region body
PF: predicated region fallthrough
CT: control target
= control target key end

     0   :  { %7 = vsyncpa [#allocation3], 0  ;;  %s199_s0 = inlined_call_operand.hbm [shape: f32[16,128], index: 0, kind: input, shape index: {}]   ;;  %s200_s1 = inlined_call_operand.hbm [shape: f32[16,128], index: 1, kind: input, shape index: {}]   ;;  %s201_s2 = inlined_call_operand.hbm [shape: f32[8,128], index: 2, kind: output, shape index: {}]  }
   0x1   :  { %8 = vsyncpa [#allocation6], 0 }
   0x2   :  { %9 = vsyncpa [#allocation4], 0  ;;  %s170_s9 = smov [#allocation2]  }
   0x3   :  { %s21_s10 = sshll.u32 %s170_s9, 4  ;;  %s22_s10 = int_to_ptr.vmem [resolvable:$true] %s21_s10 }
   0x4   :  { %s112_s11 = scalar_lea.vmem %s22_s10, 256  ;;  %p117_p1 = scmp.lt.s32.totalorder %s22_s10, %s22_s10 }
   0x5   :  { %p113_p0 = scmp.ne.s32.totalorder %s22_s10, %s112_s11  ;;  %p118_p2 = scmp.lt.s32.totalorder %s112_s11, %s112_s11 }
   0x7   :  { %p119_p3 = por %p118_p2, %p117_p1 }
   0x9   :  { %p120_p4 = pnand %p119_p3, %p113_p0 }
   0xb   :  { %123 = shalt.err (!%p120_p4)
}
   0xc   :  { %s171_s12 = smov 128   ;;  %s172_s13 = smov 8  }
   0xd   :  { %27 = dma.hbm_to_vmem [thread:$0]  %s199_s0, 256, %s22_s10, [#allocation3], %s171_s12, %s171_s12, %s172_s13  }
   0xe   :  { %s173_s16 = smov [#allocation5]  }
   0xf   :  { %s39_s17 = sshll.u32 %s173_s16, 4  ;;  %s40_s17 = int_to_ptr.vmem [resolvable:$true] %s39_s17 }
  0x10   :  { %s132_s18 = scalar_lea.vmem %s40_s17, 256  ;;  %p137_p6 = scmp.lt.s32.totalorder %s40_s17, %s40_s17 }
  0x11   :  { %p133_p5 = scmp.ne.s32.totalorder %s40_s17, %s132_s18  ;;  %p138_p7 = scmp.lt.s32.totalorder %s132_s18, %s132_s18 }
  0x13   :  { %p139_p8 = por %p138_p7, %p137_p6 }
  0x15   :  { %p140_p9 = pnand %p139_p8, %p133_p5 }
  0x17   :  { %143 = shalt.err (!%p140_p9)
}
  0x18   :  { %45 = dma.hbm_to_vmem [thread:$0]  %s200_s1, 256, %s40_s17, [#allocation6], %s171_s12, %s171_s12, %s172_s13  }
  0x19   :  { %164 = dma.done.wait [#allocation3], 256  }
  0x1a   :  { %165 = vsyncadd [#allocation3], 4294967040 }
  0x1b   :  { %166 = dma.done.wait [#allocation6], 256  }
  0x1c   :  { %167 = vsyncadd [#allocation6], 4294967040  ;;  %v65_v0 = vld [vmem:[#allocation2] sm:$0xff]  ;;  %v66_v1 = vld [vmem:[#allocation2 + $0x8] sm:$0xff]  ;;  %s174_s0 = smov [#allocation7]  }
  0x1d   :  { %v67_v2 = vld [vmem:[#allocation5] sm:$0xff]  ;;  %v68_v3 = vld [vmem:[#allocation5 + $0x8] sm:$0xff]  ;;  %s84_s21 = sshll.u32 %s174_s0, 4  ;;  %s85_s21 = int_to_ptr.vmem [resolvable:$true] %s84_s21 }
  0x1e   :  { %v69_v4 = vsub.f32 %v65_v0, %v67_v2  ;;  %v70_v5 = vsub.f32 %v66_v1, %v68_v3  ;;  %s144_s22 = scalar_lea.vmem %s85_s21, 128  ;;  %p149_p11 = scmp.lt.s32.totalorder %s85_s21, %s85_s21 }
  0x1f   :  { %p145_p10 = scmp.ne.s32.totalorder %s85_s21, %s144_s22  ;;  %p150_p12 = scmp.lt.s32.totalorder %s144_s22, %s144_s22 }
  0x20   :  { %v71_v6 = vmul.f32 %v69_v4, %v69_v4  ;;  %v72_v7 = vmul.f32 %v70_v5, %v70_v5 }
  0x21   :  { %p151_p13 = por %p150_p12, %p149_p11 }
  0x22   :  { %v73_v8 = vadd.f32 %v72_v7, %v71_v6 }
  0x23   :  { %p152_p0 = pnand %p151_p13, %p145_p10 }
  0x24   :  { %77 = vst [vmem:[#allocation7] sm:$0xff] %v73_v8 }
  0x25   :  { %155 = shalt.err (!%p152_p0)
}
  0x26   :  { %87 = dma.vmem_to_hbm [thread:$0]  %s85_s21, 128, %s201_s2, [#allocation4]  }
  0x27   :  { %168 = dma.done.wait [#allocation4], 128  }
  0x28   :  { %169 = vsyncadd [#allocation4], 4294967168 }
  0x29   :  { %91 = vsyncpa [#allocation3], 1 }
  0x2a   :  { %92 = vsyncpa [#allocation6], 1 }
  0x2b   :  { %93 = vsyncpa [#allocation4], 1 }

</bundles_post_ra>
